<compile_context>
chip_gen: v5e
topology: v5e:2x2
jax: 0.10.0
libtpu: 0.0.40
codegen_flags: <defaults>
</compile_context>

<pallas_src>
import functools

import jax
import jax.numpy as jnp
from jax.experimental import pallas as pl
from jax.experimental.pallas import tpu as pltpu

# ---- module-level constants that the PyTorch file uses as globals ----------
Lx = 1.0
Ly = 1.0
dim_inp = 2

_F32 = jnp.float32


def _round_up(v, m):
    return int(pl.cdiv(int(v), m)) * m


def _tpu_vmem_capacity_bytes():
    """Per-TensorCore VMEM capacity; conservative fallback if query fails."""
    try:
        return int(pltpu.get_tpu_info().vmem_capacity_bytes)
    except Exception:
        return 64 << 20  # assume the smallest (v7x) so tiles always fit


# ---------------------------- Pallas kernel ---------------------------------
def _rbf_kernel(x_ref, c_ref, o_ref, *, k_func):
    # x_ref: (TN, 2)   input coordinates (ragged last N block handled by Pallas)
    # c_ref: (8, TK)   row 0 = centre x, row 1 = centre y,
    #                  row 2 = scale (gaussian: -1/w^2, matern: 1/w), rest pad
    # o_ref: (TN, TK)  output block (lane-dense K)
    x = x_ref[...]
    x0 = x[:, 0:1]                               # (TN, 1)
    x1 = x[:, 1:2]
    c0 = c_ref[0:1, :]                           # (1, TK)
    c1 = c_ref[1:2, :]
    s = c_ref[2:3, :]

    d0 = x0 - c0
    d1 = x1 - c1
    d2 = d0 * d0 + d1 * d1                       # (TN, TK) squared distance

    if k_func == "gaussian":
        # exp(-(sqrt(d2)/w)^2) == exp(d2 * (-1/w^2));  no sqrt, no divide.
        phi = jnp.exp(d2 * s)
    elif k_func == "matern32":
        r = jnp.sqrt(d2) * s                     # s = 1/w
        s3 = 3.0 ** 0.5
        phi = (1.0 + s3 * r) * jnp.exp(-s3 * r)
    elif k_func == "matern52":
        r = jnp.sqrt(d2) * s                     # s = 1/w
        s5 = 5.0 ** 0.5
        phi = (1.0 + s5 * r + (5.0 / 3.0) * r * r) * jnp.exp(-s5 * r)
    else:
        raise ValueError(f"unknown k_func: {k_func}")

    o_ref[...] = phi.astype(o_ref.dtype)


# -------------------- centre-side preprocessing (cacheable) -----------------
def prepare_rbf_params(centres, widths, *, k_func="gaussian", tile_k=512):
    """Pack centres + per-centre scales into one lane-dense (8, k_pad) array.

    Only depends on centres/widths/k_func -> hoist out of the per-step path
    and cache it; returns (packed, k, tile_k).
    """
    k = int(centres.shape[0])
    k_pad = _round_up(k, 128)                    # lane-dense output columns
    tile_k = min(_round_up(tile_k, 128), k_pad)
    k_pad = _round_up(k_pad, tile_k)

    cf = centres.astype(_F32)
    tiny = jnp.finfo(_F32).tiny
    # pad widths with 1.0 so padded lanes stay finite; guard w^2 underflow
    w_pad = jnp.ones((k_pad,), _F32).at[:k].set(widths.astype(_F32))
    if k_func == "gaussian":
        scale = -1.0 / jnp.maximum(w_pad * w_pad, tiny)
    else:
        scale = 1.0 / jnp.maximum(w_pad, tiny)

    packed = jnp.zeros((8, k_pad), _F32)
    packed = packed.at[0, :k].set(cf[:, 0])
    packed = packed.at[1, :k].set(cf[:, 1])
    packed = packed.at[2, :].set(scale)
    return packed, k, tile_k


# ------------------------------ forward pass --------------------------------
def rbf_forward_packed(x, packed, k, *, k_func="gaussian", tile_k,
                       out_dtype=jnp.float32, target_block_bytes=2 << 20,
                       return_padded=False):
    """x (N, 2), packed (8, k_pad) from prepare_rbf_params -> (N, K)."""
    n = int(x.shape[0])
    assert x.shape[1] == dim_inp
    k_pad = int(packed.shape[1])
    assert k_pad % tile_k == 0
    itemsize = jnp.dtype(out_dtype).itemsize

    # --- generation-aware VMEM budget ---------------------------------------
    vmem_cap = _tpu_vmem_capacity_bytes()             # 64 MiB v7x, 128 MiB v5e/v6e
    tile_budget = min(vmem_cap // 3, 24 << 20)        # double-buffered tile bytes
    vmem_limit = min((vmem_cap * 3) // 4, 96 << 20)   # 48 MiB v7x, 96 MiB v5e/v6e

    # --- tile_n: big output blocks (>= ~2 MiB) within the VMEM budget --------
    tile_n = max(8, target_block_bytes // (tile_k * itemsize))
    tile_n = max(8, _round_up(min(tile_n, _round_up(n, 8)), 8))

    def _tiles_bytes(tn):
        out_b = 2 * tn * tile_k * itemsize            # double-buffered output
        x_b = 2 * tn * 128 * 4                        # (tn, 2) lane-pads to 128
        c_b = 2 * 8 * tile_k * 4
        return out_b + x_b + c_b

    while tile_n > 8 and _tiles_bytes(tile_n) > tile_budget:
        tile_n = max(8, _round_up(tile_n // 2, 8))

    # --- >= 2 grid blocks so both v7x TensorCores get work -------------------
    if (pl.cdiv(n, tile_n) * (k_pad // tile_k)) < 2 and n >= 16:
        tile_n = max(8, _round_up(pl.cdiv(n, 2), 8))

    grid = (pl.cdiv(n, tile_n), k_pad // tile_k)

    flops_per_elem = 6 if k_func == "gaussian" else 12
    trans_per_elem = 1 if k_func == "gaussian" else 2     # exp (+ sqrt)
    cost = pl.CostEstimate(
        flops=flops_per_elem * n * k_pad,
        transcendentals=trans_per_elem * n * k_pad,
        bytes_accessed=itemsize * n * k_pad + 4 * (n * dim_inp + 8 * k_pad),
    )

    out = pl.pallas_call(
        functools.partial(_rbf_kernel, k_func=k_func),
        out_shape=jax.ShapeDtypeStruct((n, k_pad), out_dtype),
        grid_spec=pltpu.PrefetchScalarGridSpec(
            num_scalar_prefetch=0,
            grid=grid,
            in_specs=[
                pl.BlockSpec((tile_n, dim_inp), lambda i, j: (i, 0)),  # x
                pl.BlockSpec((8, tile_k), lambda i, j: (0, j)),        # centres+scale
            ],
            out_specs=pl.BlockSpec((tile_n, tile_k), lambda i, j: (i, j)),
        ),
        compiler_params=pltpu.CompilerParams(
            dimension_semantics=("parallel", "parallel"),
            vmem_limit_bytes=vmem_limit,
        ),
        cost_estimate=cost,
    )(x.astype(_F32), packed)

    if return_padded or k == k_pad:
        return out
    # Only paid when K isn't already a multiple of 128; padded columns hold
    # nonzero kernel values (w=1), so keep the slice unless the consumer
    # explicitly absorbs them (return_padded=True).
    return out[:, :k]


def rbf_forward(x, centres, widths, *, k_func="gaussian", tile_k=512,
                out_dtype=jnp.float32, return_padded=False):
    """Convenience wrapper: x (N, 2), centres (K, 2), widths (K,) -> (N, K)."""
    packed, k, tile_k = prepare_rbf_params(centres, widths,
                                           k_func=k_func, tile_k=tile_k)
    return rbf_forward_packed(x, packed, k, k_func=k_func, tile_k=tile_k,
                              out_dtype=out_dtype, return_padded=return_padded)


# ----------------------- parameter setup (plain JAX glue) -------------------
def make_rbf_parameters(k_dens):
    """Mirror of RBFLayer.__init__/setParameters, deterministic."""
    k_x = int(Lx * k_dens + 1)
    k_y = int(Ly * k_dens + 1)

    cx = jnp.repeat(jnp.linspace(0.0, Lx, k_x), k_y)   # repeat_interleave
    cy = jnp.tile(jnp.linspace(0.0, Ly, k_y), k_x)     # repeat
    centres = jnp.stack([cx, cy], axis=1).astype(_F32)  # (K, 2)

    # torch.cdist(centres, centres, p=2); max over dim=0
    diff = centres[:, None, :] - centres[None, :, :]
    cdist = jnp.sqrt(jnp.sum(diff * diff, axis=-1))
    widths = jnp.max(cdist, axis=0) / (2 * min(k_x, k_y)) ** 0.5  # (K,)

    return centres, widths.astype(_F32)


def rbf_reference(x, centres, widths, k_func="gaussian"):
    """Pure-JAX reference of RBFLayer.getOutput for correctness checking."""
    diff = x[:, None, :] - centres[None, :, :]
    dist = jnp.linalg.norm(diff, axis=2)
    r = dist / widths[None, :]
    if k_func == "gaussian":
        return jnp.exp(-(r ** 2))
    if k_func == "matern32":
        s3 = 3.0 ** 0.5
        return (1.0 + s3 * r) * jnp.exp(-s3 * r)
    s5 = 5.0 ** 0.5
    return (1.0 + s5 * r + 5.0 / 3.0 * r ** 2) * jnp.exp(-s5 * r)


# TODO(synk): getDerivative (per-centre torch.autograd.grad loop) is not a
# forward-pass op; it would be jax.jacrev over rbf_forward outside the kernel.

if __name__ == "__main__":
    key = jax.random.PRNGKey(0)

    # Case 1: small demo — 16 points, k_dens=3 -> 4x4 = 16 centres, gaussian.
    N = 16
    X = jax.random.uniform(key, (N, dim_inp), dtype=_F32)
    centres, widths = make_rbf_parameters(k_dens=3)            # (16, 2), (16,)

    out = jax.block_until_ready(
        rbf_forward(X, centres, widths, k_func="gaussian"))
    ref = rbf_reference(X, centres, widths, k_func="gaussian")
    assert out.shape == (N, centres.shape[0])
    assert jnp.allclose(out, ref, atol=1e-5, rtol=1e-5), "gaussian mismatch"

    # Case 2: ragged N and K (exercises the ragged-grid path) + matern52,
    # using the cached/prepacked centre params across two forward calls.
    N2 = 300
    centres2, widths2 = make_rbf_parameters(k_dens=10)         # (121, 2), (121,)
    packed2, k2, tk2 = prepare_rbf_params(centres2, widths2, k_func="matern52")
    X2a = jax.random.uniform(jax.random.PRNGKey(1), (N2, dim_inp), dtype=_F32)
    X2b = jax.random.uniform(jax.random.PRNGKey(2), (N2, dim_inp), dtype=_F32)
    out2a = jax.block_until_ready(
        rbf_forward_packed(X2a, packed2, k2, k_func="matern52", tile_k=tk2))
    out2b = jax.block_until_ready(
        rbf_forward_packed(X2b, packed2, k2, k_func="matern52", tile_k=tk2))
    ref2a = rbf_reference(X2a, centres2, widths2, k_func="matern52")
    ref2b = rbf_reference(X2b, centres2, widths2, k_func="matern52")
    assert out2a.shape == (N2, centres2.shape[0])
    assert jnp.allclose(out2a, ref2a, atol=1e-5, rtol=1e-5), "matern52 mismatch"
    assert jnp.allclose(out2b, ref2b, atol=1e-5, rtol=1e-5), "matern52 mismatch"

    # Case 3: bf16 output storage (f32 math in-kernel), matern32 branch.
    out3 = jax.block_until_ready(
        rbf_forward(X2a, centres2, widths2, k_func="matern32",
                    out_dtype=jnp.bfloat16))
    ref3 = rbf_reference(X2a, centres2, widths2, k_func="matern32")
    assert out3.dtype == jnp.bfloat16
    assert jnp.allclose(out3.astype(_F32), ref3, atol=1e-2, rtol=1e-2), \
        "bf16 matern32 mismatch"

    print("KERNEL_OK")
</pallas_src>

<mosaic_0001>
module attributes {stable_mosaic.version = 11 : i64} {
  func.func @_rbf_kernel(%arg0: i32, %arg1: i32, %arg2: memref<8x2xf32, #tpu.memory_space<vmem>>, %arg3: memref<8x128xf32, #tpu.memory_space<vmem>>, %arg4: memref<8x128xf32, #tpu.memory_space<vmem>>) attributes {dimension_semantics = [#tpu.dimension_semantics<parallel>, #tpu.dimension_semantics<parallel>], iteration_bounds = array<i64: 2, 1>, scalar_prefetch = 0 : i64, scratch_operands = 0 : i64, tpu.core_type = #tpu.core_type<tc>, window_params = [{transform_indices = @transform_0, window_bounds = array<i64: 8, 2>}, {transform_indices = @transform_1, window_bounds = array<i64: 8, 128>}, {transform_indices = @transform_2, window_bounds = array<i64: 8, 128>}]} {
    %c0 = arith.constant 0 : index
    %c0_0 = arith.constant 0 : index
    %0 = vector.load %arg2[%c0, %c0_0] : memref<8x2xf32, #tpu.memory_space<vmem>>, vector<8x2xf32>
    %1 = vector.extract_strided_slice %0 {offsets = [0, 0], sizes = [8, 1], strides = [1, 1]} : vector<8x2xf32> to vector<8x1xf32>
    %2 = vector.extract_strided_slice %0 {offsets = [0, 1], sizes = [8, 1], strides = [1, 1]} : vector<8x2xf32> to vector<8x1xf32>
    %c0_1 = arith.constant 0 : index
    %c0_2 = arith.constant 0 : index
    %3 = vector.load %arg3[%c0_1, %c0_2] : memref<8x128xf32, #tpu.memory_space<vmem>>, vector<1x128xf32>
    %c1 = arith.constant 1 : index
    %c0_3 = arith.constant 0 : index
    %4 = vector.load %arg3[%c1, %c0_3] : memref<8x128xf32, #tpu.memory_space<vmem>>, vector<1x128xf32>
    %c2 = arith.constant 2 : index
    %c0_4 = arith.constant 0 : index
    %5 = vector.load %arg3[%c2, %c0_4] : memref<8x128xf32, #tpu.memory_space<vmem>>, vector<1x128xf32>
    %6 = vector.broadcast %1 : vector<8x1xf32> to vector<8x128xf32>
    %7 = vector.broadcast %3 : vector<1x128xf32> to vector<8x128xf32>
    %8 = arith.subf %6, %7 : vector<8x128xf32>
    %9 = vector.broadcast %2 : vector<8x1xf32> to vector<8x128xf32>
    %10 = vector.broadcast %4 : vector<1x128xf32> to vector<8x128xf32>
    %11 = arith.subf %9, %10 : vector<8x128xf32>
    %12 = arith.mulf %8, %8 : vector<8x128xf32>
    %13 = arith.mulf %11, %11 : vector<8x128xf32>
    %14 = arith.addf %12, %13 : vector<8x128xf32>
    %15 = vector.broadcast %5 : vector<1x128xf32> to vector<8x128xf32>
    %16 = arith.mulf %14, %15 : vector<8x128xf32>
    %17 = math.exp %16 : vector<8x128xf32>
    %c0_5 = arith.constant 0 : index
    %c0_6 = arith.constant 0 : index
    %18 = vector.load %arg4[%c0_5, %c0_6] : memref<8x128xf32, #tpu.memory_space<vmem>>, vector<8x128xf32>
    tpu.vector_store %arg4[%c0_5, %c0_6], %17 {strides = array<i32>} : memref<8x128xf32, #tpu.memory_space<vmem>>, vector<8x128xf32>,
    return
  }
  func.func @transform_0(%arg0: i32, %arg1: i32) -> (i32, i32) {
    %c0_i32 = arith.constant 0 : i32
    %c0_i32_0 = arith.constant 0 : i32
    return %arg0, %c0_i32 : i32, i32
  }
  func.func @transform_1(%arg0: i32, %arg1: i32) -> (i32, i32) {
    %c0_i32 = arith.constant 0 : i32
    %c0_i32_0 = arith.constant 0 : i32
    return %c0_i32, %arg1 : i32, i32
  }
  func.func @transform_2(%arg0: i32, %arg1: i32) -> (i32, i32) {
    %c0_i32 = arith.constant 0 : i32
    return %arg0, %arg1 : i32, i32
  }
}

</mosaic_0001>

<bundles_post_ra>
// kernel: tpu_custom_call.1
= control target key start
LH: loop header
LB: loop body
LE: loop exit
PB: predicated region body
PF: predicated region fallthrough
CT: control target
= control target key end

     0   :  { %7 = vsyncpa [#allocation3], 0  ;;  %s574_s0 = inlined_call_operand.vmem [shape: f32[16,2], index: 0, kind: input, shape index: {}]   ;;  %s575_s1 = inlined_call_operand.vmem [shape: f32[8,128], index: 1, kind: input, shape index: {}]   ;;  %s576_s2 = inlined_call_operand.hbm [shape: f32[16,128], index: 2, kind: output, shape index: {}]  }
   0x1   :  { %9 = vsyncpa [#allocation3 + $0x1], 0  ;;  %s468_s9 = smov 0   ;;  %s470_s10 = smov 0  }
   0x2   :  { %s472_s11 = smov 0   ;;  %s474_s12 = smov 0  }
   0x3   :  { %s476_s13 = smov 0   ;;  %s478_s14 = smov 0  }
   0x4 LB: > { %s295_s15 = sadd.s32 4294967295, %s449_s14   ;;  %s296_s16 = sadd.s32 4294967294, %s449_s14   ;;  %s449_s14 = sphi %s478_s14, %s15_s14   ;;  %s445_s13 = sphi %s476_s13, %s583_s13   ;;  %s441_s12 = sphi %s474_s12, %s582_s12   ;;  %s437_s11 = sphi %s472_s11, %s581_s11   ;;  %s433_s10 = sphi %s470_s10, %s580_s10   ;;  %s429_s9 = sphi %s468_s9, %s579_s9  }
   0x5   : > { %s27_s17 = sadd.s32 1, %s445_s13  ;;  %s88_s18 = sadd.s32 1, %s437_s11 }
   0x6   : > { %p29_p0 = scmp.ge.s32.totalorder %s27_s17, 2  ;;  %p98_p1 = scmp.ne.s32.totalorder %s437_s11, %s433_s10 }
   0x7   : > { %p99_p2 = scmp.eq.s32.totalorder %s295_s15, 1  ;;  %p104_p3 = scmp.ne.s32.totalorder %s433_s10, %s429_s9 }
   0x8   : > { %s585_s17 = smov (%p29_p0, %s27_s17), 0  ;;  %p105_p5 = scmp.eq.s32.totalorder %s296_s16, 1 }
   0x9   : > { %p508_p4 = por %p99_p2, %p98_p1  ;;  %s83_s20 = ssub.s32 %s445_s13, %s585_s17 }
   0xa   : > { %p300_p6 = scmp.ge.s32.totalorder %s449_s14, 1  ;;  %p86_p7 = scmp.eq.s32.totalorder %s83_s20, 0 }
   0xb   : > { %p515_p8 = por %p105_p5, %p104_p3  ;;  %p137_p9 = scmp.lt.s32.totalorder %s449_s14, 3 }
   0xc   : > { %s521_s22 = scalar_select %p86_p7, %s437_s11, %s88_s18  }
   0xd   : > { %p138_p10 = pnand %p300_p6, %p137_p9 }
   0xe   : > { %p162_p11 = scmp.lt.s32.totalorder (!%p138_p10), %s441_s12, 1  ;;  %s159_s6 = sand.u32 (!%p138_p10), 1, %s433_s10  }
   0xf   : > { %141 = sbr.rel (%p138_p10) target bundleno = 169 (0xa9), region = 28  ;;  %s301_s7 = sshll.u32 (!%p138_p10), %s159_s6, 3 }
  0x10   : > { %s304_s8 = sshll.u32 (!%p138_p10), %s441_s12, 3  ;;  %s161_s20 = scalar_lea.vmem (!%p138_p10), [#allocation2], %s301_s7 }
  0x11   : > { %s207_s18 = scalar_lea.hbm (!%p138_p10), %s576_s2, %s304_s8  ;;  %s196_s25 = scalar_lea.sflag (!%p138_p10), [#allocation3], %s159_s6 }
  0x12   : > { %s391_s29 = scalar_lea.hbm (!%p138_p10), %s576_s2, 16 }
  0x14   : > { %v451_v0 = vmov 0   ;;  %s163_s23 = scalar_select %p162_p11, %s441_s12, 1  ;;  %v452_v2 = vmov 1   ;;  %v366_v4 = vld [vmem:[%s575_s1] ss:$0 sm:$0xff] }
  0x15   : > { %364 = vset.pattern.permute.xlu0 %v451_v0  ;;  %v367_v5 = vld [vmem:[%s575_s1 + $0x1] ss:$0 sm:$0xff]  ;;  %v368_v10 = vld [vmem:[%s575_s1 + $0x2] ss:$0 sm:$0xff] }
  0x16   : > { %s302_s24 = sshll.u32 %s163_s23, 3  ;;  %s209_s23 = sshll.u32 %s161_s20, 4  ;;  %s210_s23 = int_to_ptr.vmem [resolvable:$true] %s209_s23 }
  0x17   : > { %s165_s27 = scalar_lea.vmem %s574_s0, %s302_s24  ;;  %s211_s24 = sshll.u32 %s207_s18, 4  ;;  %s212_s24 = int_to_ptr.hbm [resolvable:$true] %s211_s24 }
  0x18   : > { %v170_v1 = vld [vmem:[%s165_s27] sm:$0xff]  ;;  %s385_s26 = sshra.s32 %s212_s24, 4  ;;  %s386_s26 = int_to_ptr.hbm [resolvable:$true] %s385_s26 }
  0x19   : > { %176 = vperm.xlu0 %364, %v170_v1   ;;  %s387_s27 = scalar_lea.hbm %s386_s26, 8  ;;  %p392_p1 = scmp.lt.s32.totalorder %s386_s26, %s576_s2 }
  0x1a   : > { %p388_p12 = scmp.ne.s32.totalorder %s386_s26, %s387_s27  ;;  %p393_p2 = scmp.lt.s32.totalorder %s391_s29, %s387_s27 }
  0x1c   : > { %p389_p13 = pnand %p388_p12, %p508_p4  ;;  %p394_p3 = por %p393_p2, %p392_p1 }
  0x1e   : > { %p390_p0 = pneg %p389_p13 }
  0x20   : > { %p395_p5 = pnand %p394_p3, %p390_p0 }
  0x21   : > { %365 = vset.pattern.permute.xlu0 %v452_v2 }
  0x22   : > { %182 = vperm.xlu0 %365, %v170_v1  }
  0x8b   : > { %v177_v3 = vpop.permute.xlu0 %176 }
  0x8c   : > { %v180_v6 = vsub.f32 %v177_v3, %v366_v4 }
  0x8e   : > { %v187_v9 = vmul.f32 %v180_v6, %v180_v6 }
  0x94   : > { %v183_v7 = vpop.permute.xlu0 %182 }
  0x95   : > { %v186_v8 = vsub.f32 %v183_v7, %v367_v5 }
  0x97   : > { %v188_v11 = vmul.f32 %v186_v8, %v186_v8 }
  0x99   : > { %v189_v12 = vadd.f32 %v188_v11, %v187_v9 }
  0x9b   : > { %v191_v13 = vmul.f32 %v368_v10, %v189_v12 }
  0x9d   : > { %v192_v14 = vmul.f32 1.442695, %v191_v13 }
  0x9f   : > { %369 = vpow2.f32 %v192_v14 }
  0xa5   : > { %v370_v15 = vpop.eup %369 }
  0xa6   : > { %194 = vst [vmem:[%s161_s20] sm:$0xff] %v370_v15 }
  0xa7   : > { %398 = shalt.err (!%p395_p5)
}
  0xa8   : > { %307 = dma.vmem_to_hbm [thread:$0]  (%p508_p4), %s210_s23, 128, %s212_s24, %s196_s25  }
  0xa9 PF: > { %p313_p6 = scmp.ge.s32.totalorder %s449_s14, 2  ;;  %s223_s4 = sand.u32 1, %s429_s9  }
  0xaa   : > { %s224_s5 = scalar_lea.sflag [#allocation3], %s223_s4 }
  0xab   : > { %p310_p7 = pnand %p313_p6, %p515_p8 }
  0xad   : > { %p311_p9 = pneg %p310_p7 }
  0xaf   : > { %424 = dma.done.wait (%p311_p9), %s224_s5, 128  }
  0xb0   : > { %426 = vsyncadd (%p311_p9), %s224_s5, 4294967168  ;;  %s15_s14 = sadd.s32 1, %s449_s14   ;;  %s579_s9 = smov %s433_s10 }
  0xb1   : > { %p12_p10 = scmp.ge.s32.totalorder %s15_s14, 4   ;;  %s580_s10 = smov %s437_s11 }
  0xb2   : > { %s581_s11 = smov %s521_s22  ;;  %s582_s12 = smov %s445_s13 }
  0xb3   : > { %s583_s13 = smov %s585_s17  ;;  %14 = sbr.rel (!%p12_p10) target bundleno = 4 (0x4), region = 66 }
  0xb8   :  { %230 = vsyncpa [#allocation3], 1 }
  0xb9   :  { %232 = vsyncpa [#allocation3 + $0x1], 1 }

</bundles_post_ra>
